<compile_context>
chip_gen: v7x
topology: tpu7x:2x2x1
jax: 0.10.0
libtpu: 0.0.40
codegen_flags: <defaults>
</compile_context>

<pallas_src>
import math
from functools import partial

import jax
import jax.numpy as jnp
from jax.experimental import pallas as pl
from jax.experimental.pallas import tpu as pltpu


def _layer_norm(v, g, b, eps=1e-5):
    mu = jnp.mean(v, axis=-1, keepdims=True)
    var = jnp.mean((v - mu) ** 2, axis=-1, keepdims=True)
    return (v - mu) * jax.lax.rsqrt(var + eps) * g + b


def _encoder_kernel(src_ref, mask_ref,
                    wqkv_ref, bqkv_ref, wo_ref, w1_ref, bf1_ref, w2_ref, dvec_ref,
                    out_ref, *, num_heads, block_b, seq_len, compute_dtype):
    cd = compute_dtype
    x = src_ref[...]                          # (M, D) f32, M = block_b * seq_len
    M, D = x.shape
    H = num_heads
    dk = D // H
    scale = 1.0 / math.sqrt(dk)

    # ---- fused QKV projection: one MXU matmul, N = 3D lanes ----
    qkv = jnp.dot(x.astype(cd), wqkv_ref[...].astype(cd),
                  preferred_element_type=jnp.float32) + bqkv_ref[...]
    q = qkv[:, :D] * scale                    # fold 1/sqrt(dk) into q (M*D muls, not H*S*S)
    k = qkv[:, D:2 * D]
    v = qkv[:, 2 * D:]

    # ---- head-batched attention: (M, D) -> (block_b*H, S, dk) ----
    def to_heads(t):
        return (t.reshape(block_b, seq_len, H, dk)
                 .transpose(0, 2, 1, 3)
                 .reshape(block_b * H, seq_len, dk)
                 .astype(cd))

    q3, k3, v3 = to_heads(q), to_heads(k), to_heads(v)

    # scores: contract last dims, batched over (batch, head); no explicit K transpose
    s = jnp.einsum("bqd,bkd->bqk", q3, k3,
                   preferred_element_type=jnp.float32)          # (block_b*H, S, S) f32

    # additive mask bias computed once, broadcast over heads / query rows
    bias = jnp.where(mask_ref[...] > 0, 0.0, -1e9)              # (block_b, 1, S) f32
    bias = jnp.broadcast_to(bias[:, None], (block_b, H, 1, seq_len))
    s = s + bias.reshape(block_b * H, 1, seq_len)

    # softmax in f32; reciprocal goes to the (otherwise idle) EUP slot
    s = s - jnp.max(s, axis=-1, keepdims=True)
    p = jnp.exp(s)
    p = p * pl.reciprocal(jnp.sum(p, axis=-1, keepdims=True), approx=True)

    ctx = jnp.einsum("bqk,bkd->bqd", p.astype(cd), v3,
                     preferred_element_type=jnp.float32)        # (block_b*H, S, dk)
    ctx = (ctx.reshape(block_b, H, seq_len, dk)
              .transpose(0, 2, 1, 3)
              .reshape(M, D))

    # packed (1, D) vectors: rows = [bo, g1, be1, bf2, g2, be2]
    dvec = dvec_ref[...]
    bo, g1, be1 = dvec[0:1], dvec[1:2], dvec[2:3]
    bf2, g2, be2 = dvec[3:4], dvec[4:5], dvec[5:6]

    attn_out = jnp.dot(ctx.astype(cd), wo_ref[...].astype(cd),
                       preferred_element_type=jnp.float32) + bo
    y = _layer_norm(x + attn_out, g1, be1)

    # ---- position-wise FFN: Linear -> ReLU -> Linear ----
    h1 = jnp.maximum(
        jnp.dot(y.astype(cd), w1_ref[...].astype(cd),
                preferred_element_type=jnp.float32) + bf1_ref[...], 0.0)
    h2 = jnp.dot(h1.astype(cd), w2_ref[...].astype(cd),
                 preferred_element_type=jnp.float32) + bf2
    out_ref[...] = _layer_norm(y + h2, g2, be2).astype(out_ref.dtype)


def _pick_block_b(batch, seq_len, target_rows=512):
    """Largest batch tile that keeps M = block_b*S modest and >=2 grid steps (megacore)."""
    divisors = [d for d in range(1, batch + 1) if batch % d == 0]
    fitting = [d for d in divisors if d * seq_len <= target_rows] or [1]
    multi_step = [d for d in fitting if batch // d >= 2]
    return max(multi_step) if multi_step else max(fitting)


def encoder_layer_pallas(src, mask, params, num_heads, *,
                         block_b=None, compute_dtype=jnp.bfloat16):
    B, S, D = src.shape
    if block_b is None:
        block_b = _pick_block_b(B, S)
    assert B % block_b == 0
    num_blocks = B // block_b

    # pack the 16 parameter arrays into 7 resident kernel inputs
    wqkv = jnp.concatenate([params["wq"], params["wk"], params["wv"]], axis=1)   # (D, 3D)
    bqkv = jnp.concatenate([params["bq"], params["bk"], params["bv"]], axis=1)   # (1, 3D)
    dvec = jnp.concatenate([params["bo"], params["g1"], params["be1"],
                            params["bf2"], params["g2"], params["be2"]], axis=0)  # (6, D)
    weight_list = [wqkv, bqkv, params["wo"], params["w1"], params["bf1"],
                   params["w2"], dvec]

    src_flat = src.reshape(B * S, D)      # token-major slab; block is (block_b*S, D)

    in_specs = [
        pl.BlockSpec((block_b * S, D), lambda b: (b, 0)),    # tokens of block_b batch rows
        pl.BlockSpec((block_b, 1, S), lambda b: (b, 0, 0)),  # mask for those rows
    ] + [
        pl.BlockSpec(w.shape, lambda b, n=w.ndim: (0,) * n)  # weights: whole tensor, resident
        for w in weight_list
    ]

    out_flat = pl.pallas_call(
        partial(_encoder_kernel, num_heads=num_heads, block_b=block_b,
                seq_len=S, compute_dtype=compute_dtype),
        out_shape=jax.ShapeDtypeStruct((B * S, D), jnp.float32),
        grid=(num_blocks,),
        in_specs=in_specs,
        out_specs=pl.BlockSpec((block_b * S, D), lambda b: (b, 0)),
        compiler_params=pltpu.CompilerParams(
            dimension_semantics=("parallel",),
            vmem_limit_bytes=32 * 1024 * 1024),
    )(src_flat, mask, *weight_list)
    return out_flat.reshape(B, S, D)


def encoder_layer_ref(src, mask, params, num_heads):
    """Pure-JAX reference for validation."""
    B, S, D = src.shape
    dk = D // num_heads
    scale = 1.0 / math.sqrt(dk)

    q = src @ params["wq"] + params["bq"]
    k = src @ params["wk"] + params["bk"]
    v = src @ params["wv"] + params["bv"]

    def split(t):  # (B,S,D) -> (B,H,S,dk)
        return t.reshape(B, S, num_heads, dk).transpose(0, 2, 1, 3)

    qh, kh, vh = split(q), split(k), split(v)
    s = jnp.einsum("bhqd,bhkd->bhqk", qh, kh) * scale
    s = jnp.where(mask[:, None, :, :] > 0, s, -1e9)
    p = jax.nn.softmax(s, axis=-1)
    ctx = jnp.einsum("bhqk,bhkd->bhqd", p, vh).transpose(0, 2, 1, 3).reshape(B, S, D)

    attn_out = ctx @ params["wo"] + params["bo"]
    y = _layer_norm(src + attn_out, params["g1"], params["be1"])
    h1 = jnp.maximum(y @ params["w1"] + params["bf1"], 0.0)
    h2 = h1 @ params["w2"] + params["bf2"]
    return _layer_norm(y + h2, params["g2"], params["be2"])


def make_params(key, d_model, d_ff):
    ks = jax.random.split(key, 8)
    sd = 1.0 / math.sqrt(d_model)
    sf = 1.0 / math.sqrt(d_ff)
    return {
        "wq": jax.random.normal(ks[0], (d_model, d_model), jnp.float32) * sd,
        "bq": jnp.zeros((1, d_model), jnp.float32),
        "wk": jax.random.normal(ks[1], (d_model, d_model), jnp.float32) * sd,
        "bk": jnp.zeros((1, d_model), jnp.float32),
        "wv": jax.random.normal(ks[2], (d_model, d_model), jnp.float32) * sd,
        "bv": jnp.zeros((1, d_model), jnp.float32),
        "wo": jax.random.normal(ks[3], (d_model, d_model), jnp.float32) * sd,
        "bo": jnp.zeros((1, d_model), jnp.float32),
        "g1": jnp.ones((1, d_model), jnp.float32),
        "be1": jnp.zeros((1, d_model), jnp.float32),
        "w1": jax.random.normal(ks[4], (d_model, d_ff), jnp.float32) * sd,
        "bf1": jnp.zeros((1, d_ff), jnp.float32),
        "w2": jax.random.normal(ks[5], (d_ff, d_model), jnp.float32) * sf,
        "bf2": jnp.zeros((1, d_model), jnp.float32),
        "g2": jnp.ones((1, d_model), jnp.float32),
        "be2": jnp.zeros((1, d_model), jnp.float32),
    }


if __name__ == "__main__":
    B, S, D, H, F = 2, 8, 32, 4, 64

    key = jax.random.PRNGKey(0)
    k_src, k_par = jax.random.split(key)
    src = jax.random.normal(k_src, (B, S, D), jnp.float32)

    # mask: first batch fully visible, second batch masks out the last 3 positions.
    mask = jnp.ones((B, 1, S), jnp.float32)
    mask = mask.at[1, 0, S - 3:].set(0.0)

    params = make_params(k_par, D, F)
    ref = encoder_layer_ref(src, mask, params, num_heads=H)

    # f32-operand path: tight check against the pure-JAX reference
    out_f32 = jax.block_until_ready(
        encoder_layer_pallas(src, mask, params, num_heads=H,
                             compute_dtype=jnp.float32))
    assert out_f32.shape == (B, S, D)
    assert jnp.allclose(out_f32, ref, atol=5e-3, rtol=5e-3), "f32 kernel mismatch vs reference"

    # default production path: bf16 matmul operands, f32 accumulation (looser tolerance)
    out_bf16 = jax.block_until_ready(
        encoder_layer_pallas(src, mask, params, num_heads=H))
    assert out_bf16.shape == (B, S, D)
    assert jnp.allclose(out_bf16, ref, atol=8e-2, rtol=8e-2), "bf16 kernel mismatch vs reference"

    print("KERNEL_OK")
</pallas_src>

<mosaic_0001>
module attributes {stable_mosaic.version = 11 : i64} {
  func.func @_encoder_kernel(%arg0: i32, %arg1: memref<8x32xf32, #tpu.memory_space<vmem>>, %arg2: memref<1x1x8xf32, #tpu.memory_space<vmem>>, %arg3: memref<32x96xf32, #tpu.memory_space<vmem>>, %arg4: memref<1x96xf32, #tpu.memory_space<vmem>>, %arg5: memref<32x32xf32, #tpu.memory_space<vmem>>, %arg6: memref<32x64xf32, #tpu.memory_space<vmem>>, %arg7: memref<1x64xf32, #tpu.memory_space<vmem>>, %arg8: memref<64x32xf32, #tpu.memory_space<vmem>>, %arg9: memref<6x32xf32, #tpu.memory_space<vmem>>, %arg10: memref<8x32xf32, #tpu.memory_space<vmem>>) attributes {dimension_semantics = [#tpu.dimension_semantics<parallel>], iteration_bounds = array<i64: 2>, scalar_prefetch = 0 : i64, scratch_operands = 0 : i64, tpu.core_type = #tpu.core_type<tc>, window_params = [{transform_indices = @transform_0, window_bounds = array<i64: 8, 32>}, {transform_indices = @transform_1, window_bounds = array<i64: 1, 1, 8>}, {pipeline_mode = #tpu.pipeline_mode<synchronous>, transform_indices = @transform_2, window_bounds = array<i64: 32, 96>}, {pipeline_mode = #tpu.pipeline_mode<synchronous>, transform_indices = @transform_3, window_bounds = array<i64: 1, 96>}, {pipeline_mode = #tpu.pipeline_mode<synchronous>, transform_indices = @transform_4, window_bounds = array<i64: 32, 32>}, {pipeline_mode = #tpu.pipeline_mode<synchronous>, transform_indices = @transform_5, window_bounds = array<i64: 32, 64>}, {pipeline_mode = #tpu.pipeline_mode<synchronous>, transform_indices = @transform_6, window_bounds = array<i64: 1, 64>}, {pipeline_mode = #tpu.pipeline_mode<synchronous>, transform_indices = @transform_7, window_bounds = array<i64: 64, 32>}, {pipeline_mode = #tpu.pipeline_mode<synchronous>, transform_indices = @transform_8, window_bounds = array<i64: 6, 32>}, {transform_indices = @transform_9, window_bounds = array<i64: 8, 32>}]} {
    %c0 = arith.constant 0 : index
    %c0_0 = arith.constant 0 : index
    %0 = vector.load %arg1[%c0, %c0_0] : memref<8x32xf32, #tpu.memory_space<vmem>>, vector<8x32xf32>
    %c0_1 = arith.constant 0 : index
    %c0_2 = arith.constant 0 : index
    %1 = vector.load %arg3[%c0_1, %c0_2] : memref<32x96xf32, #tpu.memory_space<vmem>>, vector<32x96xf32>
    %cst = arith.constant dense<0.000000e+00> : vector<8x96xf32>
    %2 = tpu.matmul %0, %1, %cst {dimension_numbers = #tpu.dot_dimension_numbers<[1], [0], [0], [1], [0, 0, 1, 1], [], []>} : vector<8x32xf32>, vector<32x96xf32>, vector<8x96xf32> -> vector<8x96xf32>
    %c0_3 = arith.constant 0 : index
    %c0_4 = arith.constant 0 : index
    %3 = vector.load %arg4[%c0_3, %c0_4] : memref<1x96xf32, #tpu.memory_space<vmem>>, vector<1x96xf32>
    %4 = vector.broadcast %3 : vector<1x96xf32> to vector<8x96xf32>
    %5 = arith.addf %2, %4 : vector<8x96xf32>
    %6 = vector.extract_strided_slice %5 {offsets = [0, 0], sizes = [8, 32], strides = [1, 1]} : vector<8x96xf32> to vector<8x32xf32>
    %cst_5 = arith.constant 0.353553385 : f32
    %7 = vector.broadcast %cst_5 : f32 to vector<8x32xf32>
    %8 = arith.mulf %6, %7 : vector<8x32xf32>
    %9 = vector.extract_strided_slice %5 {offsets = [0, 32], sizes = [8, 32], strides = [1, 1]} : vector<8x96xf32> to vector<8x32xf32>
    %10 = vector.extract_strided_slice %5 {offsets = [0, 64], sizes = [8, 32], strides = [1, 1]} : vector<8x96xf32> to vector<8x32xf32>
    %11 = vector.shape_cast %8 : vector<8x32xf32> to vector<1x8x4x8xf32>
    %12 = tpu.transpose %11, [0, 2, 1, 3] : vector<1x8x4x8xf32> -> vector<1x4x8x8xf32>
    %13 = vector.shape_cast %12 : vector<1x4x8x8xf32> to vector<4x8x8xf32>
    %14 = vector.shape_cast %9 : vector<8x32xf32> to vector<1x8x4x8xf32>
    %15 = tpu.transpose %14, [0, 2, 1, 3] : vector<1x8x4x8xf32> -> vector<1x4x8x8xf32>
    %16 = vector.shape_cast %15 : vector<1x4x8x8xf32> to vector<4x8x8xf32>
    %17 = vector.shape_cast %10 : vector<8x32xf32> to vector<1x8x4x8xf32>
    %18 = tpu.transpose %17, [0, 2, 1, 3] : vector<1x8x4x8xf32> -> vector<1x4x8x8xf32>
    %19 = vector.shape_cast %18 : vector<1x4x8x8xf32> to vector<4x8x8xf32>
    "tpu.trace_start"() <{level = 10 : i32, message = "bqd,bkd->bqk"}> : () -> ()
    %cst_6 = arith.constant dense<0.000000e+00> : vector<4x8x8xf32>
    %20 = tpu.matmul %13, %16, %cst_6 {dimension_numbers = #tpu.dot_dimension_numbers<[2], [2], [1], [1], [0, 0, 0, 1, 1, 1], [0], [0]>} : vector<4x8x8xf32>, vector<4x8x8xf32>, vector<4x8x8xf32> -> vector<4x8x8xf32>
    "tpu.trace_stop"() : () -> ()
    %c0_7 = arith.constant 0 : index
    %c0_8 = arith.constant 0 : index
    %c0_9 = arith.constant 0 : index
    %21 = vector.load %arg2[%c0_7, %c0_8, %c0_9] : memref<1x1x8xf32, #tpu.memory_space<vmem>>, vector<1x1x8xf32>
    %cst_10 = arith.constant 0.000000e+00 : f32
    %22 = vector.broadcast %cst_10 : f32 to vector<1x1x8xf32>
    %23 = arith.cmpf ogt, %21, %22 : vector<1x1x8xf32>
    %cst_11 = arith.constant 0.000000e+00 : f32
    %cst_12 = arith.constant -1.000000e+09 : f32
    %24 = vector.broadcast %cst_11 : f32 to vector<1x1x8xf32>
    %25 = vector.broadcast %cst_12 : f32 to vector<1x1x8xf32>
    %26 = arith.select %23, %24, %25 : vector<1x1x8xi1>, vector<1x1x8xf32>
    %27 = vector.shape_cast %26 : vector<1x1x8xf32> to vector<1x1x1x8xf32>
    %28 = vector.shape_cast %27 : vector<1x1x1x8xf32> to vector<1x1x1x8xf32>
    %29 = vector.broadcast %28 : vector<1x1x1x8xf32> to vector<1x4x1x8xf32>
    %30 = vector.shape_cast %29 : vector<1x4x1x8xf32> to vector<4x1x8xf32>
    %31 = vector.broadcast %30 : vector<4x1x8xf32> to vector<4x8x8xf32>
    %32 = arith.addf %20, %31 : vector<4x8x8xf32>
    %cst_13 = arith.constant dense<0xFF800000> : vector<4x8xf32>
    %33 = vector.multi_reduction <maximumf>, %32, %cst_13 [2] : vector<4x8x8xf32> to vector<4x8xf32>
    %34 = vector.shape_cast %33 : vector<4x8xf32> to vector<4x8x1xf32>
    %35 = vector.broadcast %34 : vector<4x8x1xf32> to vector<4x8x8xf32>
    %36 = arith.subf %32, %35 : vector<4x8x8xf32>
    %37 = math.exp %36 : vector<4x8x8xf32>
    %cst_14 = arith.constant dense<0.000000e+00> : vector<4x8xf32>
    %38 = vector.multi_reduction <add>, %37, %cst_14 [2] : vector<4x8x8xf32> to vector<4x8xf32>
    %39 = vector.shape_cast %38 : vector<4x8xf32> to vector<4x8x1xf32>
    %40 = tpu.reciprocal %39 {approx = true} : vector<4x8x1xf32> -> vector<4x8x1xf32>
    %41 = vector.broadcast %40 : vector<4x8x1xf32> to vector<4x8x8xf32>
    %42 = arith.mulf %37, %41 : vector<4x8x8xf32>
    "tpu.trace_start"() <{level = 10 : i32, message = "bqk,bkd->bqd"}> : () -> ()
    %cst_15 = arith.constant dense<0.000000e+00> : vector<4x8x8xf32>
    %43 = tpu.matmul %42, %19, %cst_15 {dimension_numbers = #tpu.dot_dimension_numbers<[2], [1], [1], [2], [0, 0, 0, 1, 1, 2], [0], [0]>} : vector<4x8x8xf32>, vector<4x8x8xf32>, vector<4x8x8xf32> -> vector<4x8x8xf32>
    "tpu.trace_stop"() : () -> ()
    %44 = vector.shape_cast %43 : vector<4x8x8xf32> to vector<1x4x8x8xf32>
    %45 = tpu.transpose %44, [0, 2, 1, 3] : vector<1x4x8x8xf32> -> vector<1x8x4x8xf32>
    %46 = vector.shape_cast %45 : vector<1x8x4x8xf32> to vector<8x32xf32>
    %c0_16 = arith.constant 0 : index
    %c0_17 = arith.constant 0 : index
    %47 = vector.load %arg9[%c0_16, %c0_17] : memref<6x32xf32, #tpu.memory_space<vmem>>, vector<6x32xf32>
    %48 = vector.extract_strided_slice %47 {offsets = [0, 0], sizes = [1, 32], strides = [1, 1]} : vector<6x32xf32> to vector<1x32xf32>
    %49 = vector.extract_strided_slice %47 {offsets = [1, 0], sizes = [1, 32], strides = [1, 1]} : vector<6x32xf32> to vector<1x32xf32>
    %50 = vector.extract_strided_slice %47 {offsets = [2, 0], sizes = [1, 32], strides = [1, 1]} : vector<6x32xf32> to vector<1x32xf32>
    %51 = vector.extract_strided_slice %47 {offsets = [3, 0], sizes = [1, 32], strides = [1, 1]} : vector<6x32xf32> to vector<1x32xf32>
    %52 = vector.extract_strided_slice %47 {offsets = [4, 0], sizes = [1, 32], strides = [1, 1]} : vector<6x32xf32> to vector<1x32xf32>
    %53 = vector.extract_strided_slice %47 {offsets = [5, 0], sizes = [1, 32], strides = [1, 1]} : vector<6x32xf32> to vector<1x32xf32>
    %c0_18 = arith.constant 0 : index
    %c0_19 = arith.constant 0 : index
    %54 = vector.load %arg5[%c0_18, %c0_19] : memref<32x32xf32, #tpu.memory_space<vmem>>, vector<32x32xf32>
    %cst_20 = arith.constant dense<0.000000e+00> : vector<8x32xf32>
    %55 = tpu.matmul %46, %54, %cst_20 {dimension_numbers = #tpu.dot_dimension_numbers<[1], [0], [0], [1], [0, 0, 1, 1], [], []>} : vector<8x32xf32>, vector<32x32xf32>, vector<8x32xf32> -> vector<8x32xf32>
    %56 = vector.broadcast %48 : vector<1x32xf32> to vector<8x32xf32>
    %57 = arith.addf %55, %56 : vector<8x32xf32>
    %58 = arith.addf %0, %57 : vector<8x32xf32>
    %cst_21 = arith.constant dense<0.000000e+00> : vector<8xf32>
    %59 = vector.multi_reduction <add>, %58, %cst_21 [1] : vector<8x32xf32> to vector<8xf32>
    %60 = vector.shape_cast %59 : vector<8xf32> to vector<8x1xf32>
    %cst_22 = arith.constant 3.200000e+01 : f32
    %61 = vector.broadcast %cst_22 : f32 to vector<8x1xf32>
    %62 = arith.divf %60, %61 : vector<8x1xf32>
    %63 = vector.broadcast %62 : vector<8x1xf32> to vector<8x32xf32>
    %64 = arith.subf %58, %63 : vector<8x32xf32>
    %65 = arith.mulf %64, %64 : vector<8x32xf32>
    %cst_23 = arith.constant dense<0.000000e+00> : vector<8xf32>
    %66 = vector.multi_reduction <add>, %65, %cst_23 [1] : vector<8x32xf32> to vector<8xf32>
    %67 = vector.shape_cast %66 : vector<8xf32> to vector<8x1xf32>
    %cst_24 = arith.constant 3.200000e+01 : f32
    %68 = vector.broadcast %cst_24 : f32 to vector<8x1xf32>
    %69 = arith.divf %67, %68 : vector<8x1xf32>
    %70 = vector.broadcast %62 : vector<8x1xf32> to vector<8x32xf32>
    %71 = arith.subf %58, %70 : vector<8x32xf32>
    %cst_25 = arith.constant 9.99999974E-6 : f32
    %72 = vector.broadcast %cst_25 : f32 to vector<8x1xf32>
    %73 = arith.addf %69, %72 : vector<8x1xf32>
    %74 = math.rsqrt %73 : vector<8x1xf32>
    %75 = vector.broadcast %74 : vector<8x1xf32> to vector<8x32xf32>
    %76 = arith.mulf %71, %75 : vector<8x32xf32>
    %77 = vector.broadcast %49 : vector<1x32xf32> to vector<8x32xf32>
    %78 = arith.mulf %76, %77 : vector<8x32xf32>
    %79 = vector.broadcast %50 : vector<1x32xf32> to vector<8x32xf32>
    %80 = arith.addf %78, %79 : vector<8x32xf32>
    %c0_26 = arith.constant 0 : index
    %c0_27 = arith.constant 0 : index
    %81 = vector.load %arg6[%c0_26, %c0_27] : memref<32x64xf32, #tpu.memory_space<vmem>>, vector<32x64xf32>
    %cst_28 = arith.constant dense<0.000000e+00> : vector<8x64xf32>
    %82 = tpu.matmul %80, %81, %cst_28 {dimension_numbers = #tpu.dot_dimension_numbers<[1], [0], [0], [1], [0, 0, 1, 1], [], []>} : vector<8x32xf32>, vector<32x64xf32>, vector<8x64xf32> -> vector<8x64xf32>
    %c0_29 = arith.constant 0 : index
    %c0_30 = arith.constant 0 : index
    %83 = vector.load %arg7[%c0_29, %c0_30] : memref<1x64xf32, #tpu.memory_space<vmem>>, vector<1x64xf32>
    %84 = vector.broadcast %83 : vector<1x64xf32> to vector<8x64xf32>
    %85 = arith.addf %82, %84 : vector<8x64xf32>
    %cst_31 = arith.constant 0.000000e+00 : f32
    %86 = vector.broadcast %cst_31 : f32 to vector<8x64xf32>
    %87 = arith.maximumf %85, %86 : vector<8x64xf32>
    %c0_32 = arith.constant 0 : index
    %c0_33 = arith.constant 0 : index
    %88 = vector.load %arg8[%c0_32, %c0_33] : memref<64x32xf32, #tpu.memory_space<vmem>>, vector<64x32xf32>
    %cst_34 = arith.constant dense<0.000000e+00> : vector<8x32xf32>
    %89 = tpu.matmul %87, %88, %cst_34 {dimension_numbers = #tpu.dot_dimension_numbers<[1], [0], [0], [1], [0, 0, 1, 1], [], []>} : vector<8x64xf32>, vector<64x32xf32>, vector<8x32xf32> -> vector<8x32xf32>
    %90 = vector.broadcast %51 : vector<1x32xf32> to vector<8x32xf32>
    %91 = arith.addf %89, %90 : vector<8x32xf32>
    %92 = arith.addf %80, %91 : vector<8x32xf32>
    %cst_35 = arith.constant dense<0.000000e+00> : vector<8xf32>
    %93 = vector.multi_reduction <add>, %92, %cst_35 [1] : vector<8x32xf32> to vector<8xf32>
    %94 = vector.shape_cast %93 : vector<8xf32> to vector<8x1xf32>
    %cst_36 = arith.constant 3.200000e+01 : f32
    %95 = vector.broadcast %cst_36 : f32 to vector<8x1xf32>
    %96 = arith.divf %94, %95 : vector<8x1xf32>
    %97 = vector.broadcast %96 : vector<8x1xf32> to vector<8x32xf32>
    %98 = arith.subf %92, %97 : vector<8x32xf32>
    %99 = arith.mulf %98, %98 : vector<8x32xf32>
    %cst_37 = arith.constant dense<0.000000e+00> : vector<8xf32>
    %100 = vector.multi_reduction <add>, %99, %cst_37 [1] : vector<8x32xf32> to vector<8xf32>
    %101 = vector.shape_cast %100 : vector<8xf32> to vector<8x1xf32>
    %cst_38 = arith.constant 3.200000e+01 : f32
    %102 = vector.broadcast %cst_38 : f32 to vector<8x1xf32>
    %103 = arith.divf %101, %102 : vector<8x1xf32>
    %104 = vector.broadcast %96 : vector<8x1xf32> to vector<8x32xf32>
    %105 = arith.subf %92, %104 : vector<8x32xf32>
    %cst_39 = arith.constant 9.99999974E-6 : f32
    %106 = vector.broadcast %cst_39 : f32 to vector<8x1xf32>
    %107 = arith.addf %103, %106 : vector<8x1xf32>
    %108 = math.rsqrt %107 : vector<8x1xf32>
    %109 = vector.broadcast %108 : vector<8x1xf32> to vector<8x32xf32>
    %110 = arith.mulf %105, %109 : vector<8x32xf32>
    %111 = vector.broadcast %52 : vector<1x32xf32> to vector<8x32xf32>
    %112 = arith.mulf %110, %111 : vector<8x32xf32>
    %113 = vector.broadcast %53 : vector<1x32xf32> to vector<8x32xf32>
    %114 = arith.addf %112, %113 : vector<8x32xf32>
    %c0_40 = arith.constant 0 : index
    %c0_41 = arith.constant 0 : index
    %115 = vector.load %arg10[%c0_40, %c0_41] : memref<8x32xf32, #tpu.memory_space<vmem>>, vector<8x32xf32>
    tpu.vector_store %arg10[%c0_40, %c0_41], %114 {strides = array<i32>} : memref<8x32xf32, #tpu.memory_space<vmem>>, vector<8x32xf32>,
    return
  }
  func.func @transform_0(%arg0: i32) -> (i32, i32) {
    %c0_i32 = arith.constant 0 : i32
    %c0_i32_0 = arith.constant 0 : i32
    return %arg0, %c0_i32 : i32, i32
  }
  func.func @transform_1(%arg0: i32) -> (i32, i32, i32) {
    %c0_i32 = arith.constant 0 : i32
    %c0_i32_0 = arith.constant 0 : i32
    %c0_i32_1 = arith.constant 0 : i32
    return %arg0, %c0_i32, %c0_i32_0 : i32, i32, i32
  }
  func.func @transform_2(%arg0: i32) -> (i32, i32) {
    %c0_i32 = arith.constant 0 : i32
    %c0_i32_0 = arith.constant 0 : i32
    %c0_i32_1 = arith.constant 0 : i32
    return %c0_i32, %c0_i32_0 : i32, i32
  }
  func.func @transform_3(%arg0: i32) -> (i32, i32) {
    %c0_i32 = arith.constant 0 : i32
    %c0_i32_0 = arith.constant 0 : i32
    %c0_i32_1 = arith.constant 0 : i32
    return %c0_i32, %c0_i32_0 : i32, i32
  }
  func.func @transform_4(%arg0: i32) -> (i32, i32) {
    %c0_i32 = arith.constant 0 : i32
    %c0_i32_0 = arith.constant 0 : i32
    %c0_i32_1 = arith.constant 0 : i32
    return %c0_i32, %c0_i32_0 : i32, i32
  }
  func.func @transform_5(%arg0: i32) -> (i32, i32) {
    %c0_i32 = arith.constant 0 : i32
    %c0_i32_0 = arith.constant 0 : i32
    %c0_i32_1 = arith.constant 0 : i32
    return %c0_i32, %c0_i32_0 : i32, i32
  }
  func.func @transform_6(%arg0: i32) -> (i32, i32) {
    %c0_i32 = arith.constant 0 : i32
    %c0_i32_0 = arith.constant 0 : i32
    %c0_i32_1 = arith.constant 0 : i32
    return %c0_i32, %c0_i32_0 : i32, i32
  }
  func.func @transform_7(%arg0: i32) -> (i32, i32) {
    %c0_i32 = arith.constant 0 : i32
    %c0_i32_0 = arith.constant 0 : i32
    %c0_i32_1 = arith.constant 0 : i32
    return %c0_i32, %c0_i32_0 : i32, i32
  }
  func.func @transform_8(%arg0: i32) -> (i32, i32) {
    %c0_i32 = arith.constant 0 : i32
    %c0_i32_0 = arith.constant 0 : i32
    %c0_i32_1 = arith.constant 0 : i32
    return %c0_i32, %c0_i32_0 : i32, i32
  }
  func.func @transform_9(%arg0: i32) -> (i32, i32) {
    %c0_i32 = arith.constant 0 : i32
    %c0_i32_0 = arith.constant 0 : i32
    return %arg0, %c0_i32 : i32, i32
  }
}

</mosaic_0001>

<bundles_post_ra>
// kernel: tpu_custom_call.1
= control target key start
LH: loop header
LB: loop body
LE: loop exit
PB: predicated region body
PF: predicated region fallthrough
CT: control target
= control target key end

     0   :  { %14 = vsyncpa [#allocation3], 0  ;;  %s2981_s0 = inlined_call_operand.hbm [shape: f32[16,32], index: 0, kind: input, shape index: {}]   ;;  %s2982_s1 = inlined_call_operand.vmem [shape: f32[2,1,8], index: 1, kind: input, shape index: {}]   ;;  %s2983_s2 = inlined_call_operand.vmem [shape: f32[32,96], index: 2, kind: input, shape index: {}]   ;;  %s2984_s3 = inlined_call_operand.vmem [shape: f32[1,96], index: 3, kind: input, shape index: {}]   ;;  %s2985_s4 = inlined_call_operand.vmem [shape: f32[32,32], index: 4, kind: input, shape index: {}]   ;;  %s2986_s5 = inlined_call_operand.vmem [shape: f32[32,64], index: 5, kind: input, shape index: {}]   ;;  %s2987_s6 = inlined_call_operand.vmem [shape: f32[1,64], index: 6, kind: input, shape index: {}]   ;;  %s2988_s7 = inlined_call_operand.vmem [shape: f32[64,32], index: 7, kind: input, shape index: {}]   ;;  %s2989_s8 = inlined_call_operand.vmem [shape: f32[6,32], index: 8, kind: input, shape index: {}]   ;;  %s2990_s9 = inlined_call_operand.hbm [shape: f32[16,32], index: 9, kind: output, shape index: {}]  }
   0x1   :  { %16 = vsyncpa [#allocation3 + $0x1], 0 }
   0x2   :  { %17 = vsyncpa [#allocation4], 0 }
   0x3   :  { %19 = vsyncpa [#allocation4 + $0x1], 0  ;;  %s2541_s30 = smov 0   ;;  %s2543_s10 = smov 0  }
   0x4   :  { %s2545_s11 = smov 0   ;;  %s2547_s12 = smov 0  }
   0x5 LB: > { %s2562_s13 = sadd.s32 4294967295, %s2473_s12   ;;  %s2097_s14 = sadd.s32 4294967294, %s2473_s12   ;;  %s2473_s12 = sphi %s2547_s12, %s3005_s12   ;;  %s2469_s11 = sphi %s2545_s11, %s3004_s11   ;;  %s2465_s10 = sphi %s2543_s10, %s3003_s10   ;;  %s2461_s30 = sphi %s2541_s30, %s3002_s30  }
   0x6   : > { %s2566_s15 = sadd.s32 1, %s2473_s12   ;;  %s32_s16 = sadd.s32 1, %s2469_s11 }
   0x7   : > { %s29_s17 = ssub.s32 %s2473_s12, %s2566_s15  ;;  %p39_p0 = scmp.ne.s32.totalorder %s2469_s11, %s2465_s10 }
   0x8   : > { %p30_p1 = scmp.eq.s32.totalorder %s29_s17, 0  ;;  %p40_p2 = scmp.eq.s32.totalorder %s2473_s12, 0 }
   0x9   : > { %p45_p3 = scmp.ne.s32.totalorder %s2465_s10, %s2461_s30  ;;  %p46_p4 = scmp.eq.s32.totalorder %s2562_s13, 0 }
   0xa   : > { %s2578_s18 = scalar_select %p30_p1, %s2469_s11, %s32_s16  }
   0xb   : > { %p2580_p5 = por %p40_p2, %p39_p0  ;;  %p2584_p6 = por %p46_p4, %p45_p3 }
   0xc   : > { %p242_p7 = scmp.eq.s32.totalorder %s2562_s13, 1  ;;  %p248_p8 = scmp.eq.s32.totalorder %s2097_s14, 1 }
   0xd   : > { %p2309_p10 = scmp.lt.s32.totalorder %s2473_s12, 2  ;;  %s289_s23 = sand.u32 1, %s2469_s11  }
   0xe   : > { %p2591_p11 = por %p242_p7, %p39_p0  ;;  %p2595_p12 = por %p248_p8, %p45_p3 }
   0xf   : > { %s2101_s24 = sshll.u32 %s2473_s12, 7  ;;  %s2100_s25 = sshll.u32 %s289_s23, 3 }
  0x10   : > { %s2994_s21 = scalar_select %p2591_p11, 1, 0 }
  0x11   : > { %s2995_s22 = scalar_select %p2595_p12, 1, 0 }
  0x12   : > { %s2604_s28 = scalar_lea.hbm %s2981_s0, %s2101_s24  ;;  %s293_s29 = scalar_lea.vmem [#allocation2], %s2100_s25 }
  0x13   : > { %s300_s14 = sshll.u32 %s293_s29, 4  ;;  %p2608_p13 = pnand %p2309_p10, %p2580_p5  ;;  %s2612_s14 = int_to_ptr.vmem [resolvable:$true] %s300_s14 }
  0x14   : > { %s290_s17 = scalar_lea.sflag [#allocation3], %s289_s23  ;;  %s2377_s24 = scalar_lea.hbm %s2604_s28, 128 }
  0x15   : > { %p2378_p2 = scmp.ne.s32.totalorder %s2604_s28, %s2377_s24  ;;  %p2379_p3 = pneg %p2608_p13 }
  0x16   : > { %s2382_s26 = scalar_lea.hbm %s2981_s0, 256  ;;  %p2383_p5 = scmp.lt.u32.totalorder %s2604_s28, %s2981_s0 }
  0x17   : > { %p2380_p4 = pnand %p2379_p3, %p2378_p2  ;;  %p2384_p8 = scmp.lt.u32.totalorder %s2382_s26, %s2377_s24 }
  0x18   : > { %p2386_p9 = scmp.lt.u32.totalorder %s2377_s24, %s2604_s28 }
  0x19   : > { %p2381_p7 = pneg %p2380_p4  ;;  %p2385_p10 = por %p2384_p8, %p2383_p5 }
  0x1b   : > { %p2387_p0 = por %p2386_p9, %p2385_p10 }
  0x1d   : > { %p2388_p1 = pnand %p2387_p0, %p2381_p7 }
  0x1f   : > { %2391 = shalt.err (!%p2388_p1)
}
  0x20   : > { %s2392_s23 = scalar_lea.vmem %s2612_s14, 128  ;;  %s2475_s19 = smov [#allocation2]  }
  0x21   : > { %p2393_p2 = scmp.ne.s32.totalorder %s2612_s14, %s2392_s23  ;;  %s2397_s25 = sshll.u32 %s2475_s19, 4  ;;  %s2398_s25 = int_to_ptr.vmem [resolvable:$false] %s2397_s25 }
  0x22   : > { %s2399_s27 = scalar_lea.vmem %s2398_s25, 256  ;;  %p2400_p11 = scmp.lt.s32.totalorder %s2612_s14, %s2398_s25 }
  0x23   : > { %p2395_p4 = pnand %p2393_p2, %p2379_p3  ;;  %p2401_p5 = scmp.lt.s32.totalorder %s2399_s27, %s2392_s23 }
  0x25   : > { %p2396_p12 = pneg %p2395_p4  ;;  %p2402_p8 = por %p2401_p5, %p2400_p11 }
  0x27   : > { %p2403_p9 = pnand %p2402_p8, %p2396_p12 }
  0x29   : > { %2406 = shalt.err (!%p2403_p9)
}
  0x2a   : > { %2304 = dma.hbm_to_vmem [thread:$0]  (!%p2608_p13), %s2604_s28, 128, %s2612_s14, %s290_s17  }
  0x2b   : > { %p2997_p0 = scmp.lt.s32.totalorder %s2473_s12, 3  ;;  %p2998_p1 = scmp.ge.s32.totalorder %s2473_s12, 1 }
  0x2d   : > { %p312_p3 = pnand %p2998_p1, %p2997_p0 }
  0x2e   : > { %s2646_s24 = sand.u32 (!%p312_p3), 1, %s2465_s10  }
  0x2f   : > { %315 = sbr.rel (%p312_p3) target bundleno = 2725 (0xaa5), region = 56  ;;  %s2103_s26 = sshll.u32 (!%p312_p3), %s2646_s24, 3 }
  0x30   : > { %s318_s29 = scalar_lea.sflag (!%p312_p3), [#allocation3], %s2646_s24  ;;  %s321_s16 = scalar_lea.vmem (!%p312_p3), [#allocation2], %s2103_s26 }
  0x36   : > { %2452 = dma.done.wait (%p2584_p6), %s318_s29, 128  }
  0x37   : > { %2454 = vsyncadd (%p2584_p6), %s318_s29, 4294967168  ;;  %v2476_v0 = vmov 0.0|0.0   ;;  %vm2477_vm0 = vmmov 0   ;;  %v2478_v1 = vmov 0.0   ;;  %v363_v2 = vld [vmem:[%s2983_s2] sm:$0xff]  ;;  %v364_v3 = vld [vmem:[%s2983_s2 + $0x8] sm:$0xff]  ;;  %v464_v20 = vlaneseq }
  0x38   : > { %2267 = vmatprep.subr.bf16.mxu1 %v2476_v0  ;;  %2183 = vmatprep.mubr.msk.f32.mxu1 %vm2477_vm0, %v2478_v1  ;;  %v365_v4 = vld [vmem:[%s2983_s2 + $0x10] sm:$0xff]  ;;  %v2268_v5 = vpack.c.bf16 %v364_v3, %v363_v2  ;;  %v366_v6 = vld [vmem:[%s2983_s2 + $0x18] sm:$0xff]  ;;  %v2675_v8 = vld [vmem:[%s321_s16] sm:$0xff]  ;;  %vm374_vm1 = vcmask 261120   ;;  %s2479_s14 = smov 104   ;;  %s2480_s16 = smov 120  }
  0x39   : > { %2196 = vmatprep.subr.mxu0 %v2478_v1  ;;  %2198 = vmatprep.mubr.msk.f32.mxu0 %vm2477_vm0, %v2478_v1  ;;  %v2271_v7 = vpack.c.bf16 %v366_v6, %v365_v4  ;;  %v2105_v9 = vld [vmem:[%s2984_s3] ss:$0 sm:$0xff]  ;;  %s2481_s17 = smov 96   ;;  %s2482_s20 = smov 112   ;;  %v2483_v18 = vmov 1983009808  }
  0x3a   : > { %2269 = vmatpush3.bf16.msra.mxu1 %v2268_v5  ;;  %v462_v19 = vunpack.c.l.s4 %v2483_v18  ;;  %v2484_v21 = vmov 1934713408   ;;  %v2701_v24 = vshrl.u32 %v464_v20, 7  ;;  %vm907_vm2 = vcmask 64512   ;;  %p359_p6 = scmp.lt.s32.totalorder %s2562_s13, 1  ;;  %s2486_s29 = smov 64  }
  0x3b   : > { %2270 = vmatprep.subr.bf16.mxu1 %v2476_v0  ;;  %v494_v22 = vunpack.c.l.s4 %v2484_v21  ;;  %s2489_s28 = smov 24   ;;  %vm1697_vm4 = vcmask 130048   ;;  %vm1699_vm5 = vcmask 195584   ;;  %vm1905_vm6 = vcmask 523264   ;;  %p2999_p12 = scmp.ne.s32.totalorder %s2994_s21, 0 }
  0x3c   : > { %v463_v23 = vunpack.c.0.s8 %v462_v19  ;;  %s360_s23 = scalar_select %p359_p6, %s2562_s13, 1 }
  0x3d   : > { %v495_v27 = vunpack.c.0.s8 %v494_v22 }
  0x3e   : > { %2272 = vmatpush3.bf16.msra.mxu1 %v2271_v7  ;;  %v2704_v28 = vsub.s32 %v463_v23, %v2701_v24  ;;  %s361_s27 = scalar_lea.vmem %s2982_s1, %s360_s23  ;;  %s2005_s23 = scalar_lea.sflag [#allocation4], %s2646_s24 }
  0x3f   : > { %2186 = vmatprep.subr.mxu1 %v2478_v1  ;;  %v2707_v35 = vsub.s32 %v495_v27, %v2701_v24 }
  0x41   : > { %2184 = vmatmul.mubr.msk.f32.vlgmr.msra.gmra.mrb[0].mxu1 %vm374_vm1, %v2675_v8 }
  0x42   : > { %2188 = vmatprep.mubr.msk.f32.mxu1 %vm2477_vm0, %v2478_v1 }
 0x114   : > { %v444_v10 = vpop.f32.mrb[0].mxu1 }
 0x115   : > { %v2685_v11 = vadd.f32 %v2105_v9, %v444_v10  ;;  %v2185_v12 = vpop.f32.mrb[1].mxu1 }
 0x117   : > { %600 = vrot.lane.b32.xlu1 %v2685_v11, %s2479_s14  ;;  %596 = vrot.lane.b32.xlu0 %v2685_v11, %s2480_s16  ;;  %v448_v13 = vmul.f32 0.35355338, %v2685_v11 }
 0x11b   : > { %602 = vrot.lane.b32.xlu1 %v2685_v11, %s2481_s17  ;;  %598 = vrot.lane.b32.xlu0 %v2685_v11, %s2482_s20 }
 0x11f   : > { %450 = vrot.lane.b32.xlu1 %v448_v13, %s2480_s16 }
 0x189   : > { %v2692_v14 = vpop.permute.xlu0 %596  ;;  %v2695_v15 = vpop.permute.xlu1 %600 }
 0x18a   : > { %604 = vrot.lane.b32.xlu0 %v2692_v14, %s2481_s17 }
 0x18d   : > { %v2697_v16 = vpop.permute.xlu0 %598  ;;  %v603_v17 = vpop.permute.xlu1 %602 }
 0x18e   : > { %608 = vrot.lane.b32.xlu0 %v2695_v15, %s2481_s17  ;;  %606 = vrot.lane.b32.xlu1 %v2697_v16, %s2481_s17 }
 0x191   : > { %v451_v25 = vpop.permute.xlu1 %450 }
 0x192   : > { %453 = vrot.lane.b32.xlu0 %v448_v13, %s2482_s20  ;;  %456 = vrot.lane.b32.xlu1 %v448_v13, %s2479_s14 }
 0x1fc   : > { %v605_v26 = vpop.permute.xlu0 %604 }
 0x200   : > { %v609_v29 = vpop.permute.xlu0 %608  ;;  %v607_v30 = vpop.permute.xlu1 %606 }
 0x201   : > { %v630_v31 = vcombine.low %v605_v26, %v609_v29  ;;  %v631_v32 = vcombine.high %v605_v26, %v609_v29  ;;  %v614_v33 = vcombine.low %v603_v17, %v607_v30  ;;  %v615_v34 = vcombine.high %v603_v17, %v607_v30 }
 0x203   : > { %v638_v36 = vrot.slane %v630_v31, %v2704_v28  ;;  %v645_v37 = vrot.slane %v631_v32, %v2704_v28  ;;  %v622_v38 = vrot.slane %v614_v33, %v2704_v28  ;;  %v629_v39 = vrot.slane %v615_v34, %v2704_v28 }
 0x204   : > { %v454_v40 = vpop.permute.xlu0 %453  ;;  %v457_v41 = vpop.permute.xlu1 %456 }
 0x205   : > { %v646_v42 = vcombine.low %v622_v38, %v638_v36  ;;  %v647_v43 = vcombine.high %v622_v38, %v638_v36  ;;  %v662_v44 = vcombine.low %v629_v39, %v645_v37  ;;  %v663_v45 = vcombine.high %v629_v39, %v645_v37 }
 0x206   : > { %v459_v46 = vcombine.low %v448_v13, %v454_v40  ;;  %v460_v47 = vcombine.high %v448_v13, %v454_v40  ;;  %v475_v48 = vcombine.low %v451_v25, %v457_v41  ;;  %v476_v49 = vcombine.high %v451_v25, %v457_v41 }
 0x207   : > { %v654_v50 = vrot.slane %v646_v42, %v2707_v35  ;;  %v661_v51 = vrot.slane %v647_v43, %v2707_v35  ;;  %v670_v52 = vrot.slane %v662_v44, %v2707_v35  ;;  %v677_v53 = vrot.slane %v663_v45, %v2707_v35 }
 0x208   : > { %v467_v54 = vrot.slane %v459_v46, %v2704_v28  ;;  %v474_v55 = vrot.slane %v460_v47, %v2704_v28  ;;  %v483_v56 = vrot.slane %v475_v48, %v2704_v28  ;;  %v490_v57 = vrot.slane %v476_v49, %v2704_v28 }
 0x209   : > { %v682_v58 = vcombine.low %v654_v50, %v661_v51  ;;  %v2109_v59 = vcombine.high %v654_v50, %v661_v51  ;;  %v698_v60 = vcombine.low %v670_v52, %v677_v53  ;;  %v2110_v61 = vcombine.high %v670_v52, %v677_v53  ;;  %v898_v52 = vld [vmem:[%s361_s27] sm:$0x1]  ;;  %s2487_s27 = smov 16  }
 0x20a   : > { %v491_v62 = vcombine.low %v467_v54, %v483_v56  ;;  %v492_v63 = vcombine.high %v467_v54, %v483_v56  ;;  %v507_v2 = vcombine.low %v474_v55, %v490_v57  ;;  %v508_v3 = vcombine.high %v474_v55, %v490_v57 }
 0x20b   : > { %v689_v4 = vrot.slane %v682_v58, %v2704_v28  ;;  %v697_v5 = vrot.slane %v2109_v59, %v2704_v28  ;;  %v705_v6 = vrot.slane %v698_v60, %v2704_v28  ;;  %v713_v7 = vrot.slane %v2110_v61, %v2704_v28 }
 0x20c   : > { %v499_v9 = vrot.slane %v491_v62, %v2707_v35  ;;  %v506_v10 = vrot.slane %v492_v63, %v2707_v35  ;;  %v515_v12 = vrot.slane %v507_v2, %v2707_v35  ;;  %v522_v13 = vrot.slane %v508_v3, %v2707_v35 }
 0x20d   : > { %v714_v17 = vcombine.low %v689_v4, %v697_v5  ;;  %v730_v18 = vcombine.low %v705_v6, %v713_v7  ;;  %v715_v19 = vcombine.high %v689_v4, %v697_v5  ;;  %v731_v20 = vcombine.high %v705_v6, %v713_v7 }
 0x20e   : > { %v527_v21 = vcombine.low %v499_v9, %v506_v10  ;;  %v2107_v22 = vcombine.high %v499_v9, %v506_v10  ;;  %v543_v23 = vcombine.low %v515_v12, %v522_v13  ;;  %v2108_v25 = vcombine.high %v515_v12, %v522_v13 }
 0x20f   : > { %v722_v26 = vrot.slane %v714_v17, %v2707_v35  ;;  %v738_v27 = vrot.slane %v730_v18, %v2707_v35  ;;  %v729_v29 = vrot.slane %v715_v19, %v2707_v35  ;;  %v745_v30 = vrot.slane %v731_v20, %v2707_v35 }
 0x210   : > { %v534_v31 = vrot.slane %v527_v21, %v2704_v28  ;;  %v542_v32 = vrot.slane %v2107_v22, %v2704_v28  ;;  %v550_v33 = vrot.slane %v543_v23, %v2704_v28  ;;  %v558_v34 = vrot.slane %v2108_v25, %v2704_v28 }
 0x211   : > { %v746_v36 = vcombine.low %v722_v26, %v738_v27  ;;  %v748_v37 = vcombine.low %v729_v29, %v745_v30  ;;  %v747_v48 = vcombine.high %v722_v26, %v738_v27  ;;  %v749_v50 = vcombine.high %v729_v29, %v745_v30 }
 0x212   : > { %v559_v38 = vcombine.low %v534_v31, %v542_v32  ;;  %v575_v39 = vcombine.low %v550_v33, %v558_v34  ;;  %v560_v40 = vcombine.high %v534_v31, %v542_v32  ;;  %v576_v41 = vcombine.high %v550_v33, %v558_v34 }
 0x213   : > { %2187 = vmatpush3.xpose.msk.msra.mxu1 %vm907_vm2, %v746_v36  ;;  %2197 = vmatpush3.xpose.msk.msra.mxu0 %vm907_vm2, %v748_v37  ;;  %vm899_vm3 = vcmp.gt.f32.partialorder %v898_v52, 0.0  ;;  %v904_v53 = vsub.s32 0, %v2701_v24  ;;  %v2485_v54 = vmov -1e+09  }
 0x214   : > { %2191 = vmatprep.subr.mxu1 %v2478_v1  ;;  %v567_v42 = vrot.slane %v559_v38, %v2707_v35  ;;  %v583_v43 = vrot.slane %v575_v39, %v2707_v35  ;;  %v574_v44 = vrot.slane %v560_v40, %v2707_v35  ;;  %v590_v45 = vrot.slane %v576_v41, %v2707_v35 }
 0x215   : > { %2206 = vmatprep.subr.mxu0 %v2478_v1  ;;  %v900_v55 = vsel %vm899_vm3, 0.0, %v2485_v54 }
 0x216   : > { %v591_v46 = vcombine.low %v567_v42, %v583_v43  ;;  %v593_v47 = vcombine.low %v574_v44, %v590_v45  ;;  %v592_v49 = vcombine.high %v567_v42, %v583_v43  ;;  %v594_v51 = vcombine.high %v574_v44, %v590_v45 }
 0x217   : > { %v905_v56 = vrot.slane %v900_v55, %v904_v53 }
 0x218   : > { %2189 = vmatmul.mubr.msk.f32.vlgmr.msra.gmra.mrb[2].mxu1 %vm907_vm2, %v591_v46  ;;  %2199 = vmatmul.mubr.msk.f32.vlgmr.msra.gmra.mrb[0].mxu0 %vm907_vm2, %v593_v47 }
 0x219   : > { %2192 = vmatpush3.xpose.msk.msra.mxu1 %vm907_vm2, %v747_v48  ;;  %2193 = vmatprep.mubr.msk.f32.mxu1 %vm2477_vm0, %v2478_v1 }
 0x21a   : > { %2201 = vmatprep.subr.mxu1 %v2478_v1  ;;  %2208 = vmatprep.mubr.msk.f32.mxu0 %vm2477_vm0, %v2478_v1 }
 0x21c   : > { %2194 = vmatmul.mubr.msk.f32.vlgmr.msra.gmra.mrb[4].mxu1 %vm907_vm2, %v592_v49 }
 0x21d   : > { %2202 = vmatpush3.xpose.msk.msra.mxu1 %vm907_vm2, %v749_v50  ;;  %2203 = vmatprep.mubr.msk.f32.mxu1 %vm2477_vm0, %v2478_v1 }
 0x21e   : > { %2211 = vmatprep.subr.mxu1 %v2478_v1 }
 0x220   : > { %2204 = vmatmul.mubr.msk.f32.vlgmr.msra.gmra.mrb[6].mxu1 %vm907_vm2, %v594_v51 }
 0x221   : > { %2213 = vmatprep.mubr.msk.f32.mxu1 %vm2477_vm0, %v2478_v1 }
 0x2eb   : > { %v980_v57 = vpop.f32.mrb[2].mxu1  ;;  %v1132_v58 = vpop.f32.mrb[0].mxu0 }
 0x2ec   : > { %v981_v59 = vadd.f32 %v980_v57, %v905_v56  ;;  %v2190_v60 = vpop.f32.mrb[3].mxu1  ;;  %v2200_v61 = vpop.f32.mrb[1].mxu0  ;;  %v1133_v62 = vadd.f32 %v1132_v58, %v905_v56 }
 0x2ee   : > { %v1212_v63 = vsel %vm907_vm2, %v981_v59, -inf  ;;  %v1218_v5 = vsel %vm907_vm2, %v1133_v62, -inf }
 0x2ef   : > { %1213 = vmax.xlane.f32.xlu0 %v1212_v63  ;;  %v1056_v2 = vpop.f32.mrb[4].mxu1 }
 0x2f0   : > { %v1057_v3 = vadd.f32 %v1056_v2, %v905_v56  ;;  %v2195_v4 = vpop.f32.mrb[5].mxu1 }
 0x2f2   : > { %v1215_v6 = vsel %vm907_vm2, %v1057_v3, -inf }
 0x2f3   : > { %1219 = vmax.xlane.f32.xlu0 %v1218_v5  ;;  %1216 = vmax.xlane.f32.xlu1 %v1215_v6  ;;  %v1208_v7 = vpop.f32.mrb[6].mxu1 }
 0x2f4   : > { %v1209_v9 = vadd.f32 %v1208_v7, %v905_v56  ;;  %v2205_v10 = vpop.f32.mrb[7].mxu1 }
 0x2f6   : > { %v1221_v12 = vsel %vm907_vm2, %v1209_v9, -inf }
 0x2f7   : > { %1222 = vmax.xlane.f32.xlu0 %v1221_v12 }
 0x304   : > { %750 = vrot.lane.b32.xlu1 %v2685_v11, %s2486_s29 }
 0x37c   : > { %v1214_v13 = vpop.xlane.xlu0 %1213 }
 0x37d   : > { %v1224_v17 = vsub.f32 %v981_v59, %v1214_v13 }
 0x37f   : > { %v1228_v18 = vmul.f32 1.442695, %v1224_v17 }
 0x380   : > { %v1220_v19 = vpop.xlane.xlu0 %1219  ;;  %v1217_v20 = vpop.xlane.xlu1 %1216 }
 0x381   : > { %2357 = vpow2.f32 %v1228_v18  ;;  %v1226_v21 = vsub.f32 %v1133_v62, %v1220_v19  ;;  %v1225_v22 = vsub.f32 %v1057_v3, %v1217_v20 }
 0x383   : > { %v1232_v23 = vmul.f32 1.442695, %v1226_v21  ;;  %v1230_v25 = vmul.f32 1.442695, %v1225_v22 }
 0x384   : > { %v1223_v26 = vpop.xlane.xlu0 %1222  ;;  %v751_v38 = vpop.permute.xlu1 %750 }
 0x385   : > { %2359 = vpow2.f32 %v1232_v23  ;;  %v1227_v27 = vsub.f32 %v1209_v9, %v1223_v26 }
 0x386   : > { %2361 = vpow2.f32 %v1230_v25 }
 0x387   : > { %v1234_v29 = vmul.f32 1.442695, %v1227_v27 }
 0x389   : > { %2363 = vpow2.f32 %v1234_v29 }
 0x38b   : > { %v2775_v30 = vpop.eup %2357 }
 0x38c   : > { %v1236_v11 = vsel %vm907_vm2, %v2775_v30, 0.0 }
 0x38d   : > { %1237 = vadd.xlane.f32.xlu1 %v1236_v11 }
 0x38f   : > { %v2779_v31 = vpop.eup %2359 }
 0x390   : > { %v2362_v32 = vpop.eup %2361  ;;  %v1242_v33 = vsel %vm907_vm2, %v2779_v31, 0.0 }
 0x391   : > { %1243 = vadd.xlane.f32.xlu1 %v1242_v33  ;;  %v1239_v34 = vsel %vm907_vm2, %v2362_v32, 0.0 }
 0x392   : > { %1240 = vadd.xlane.f32.xlu0 %v1239_v34 }
 0x393   : > { %v2784_v36 = vpop.eup %2363 }
 0x394   : > { %v1245_v37 = vsel %vm907_vm2, %v2784_v36, 0.0 }
 0x396   : > { %1246 = vadd.xlane.f32.xlu0 %v1245_v37 }
 0x3a2   : > { %754 = vrot.lane.b32.xlu1 %v2697_v16, %s2486_s29 }
 0x3a6   : > { %756 = vrot.lane.b32.xlu1 %v2695_v15, %s2486_s29 }
 0x3ac   : > { %752 = vrot.lane.b32.xlu0 %v2692_v14, %s2486_s29  ;;  %s2488_s29 = smov 8  }
 0x41a   : > { %v1238_v39 = vpop.xlane.xlu1 %1237 }
 0x41b   : > { %2365 = vrcp.f32 %v1238_v39 }
 0x41e   : > { %v1244_v40 = vpop.xlane.xlu1 %1243 }
 0x41f   : > { %v1241_v41 = vpop.xlane.xlu0 %1240 }
 0x420   : > { %2367 = vrcp.f32 %v1241_v41 }
 0x421   : > { %2369 = vrcp.f32 %v1244_v40 }
 0x422   : > { %v755_v42 = vpop.permute.xlu1 %754 }
 0x423   : > { %v1247_v43 = vpop.xlane.xlu0 %1246  ;;  %v762_v44 = vcombine.low %v751_v38, %v755_v42  ;;  %v763_v45 = vcombine.high %v751_v38, %v755_v42 }
 0x424   : > { %2371 = vrcp.f32 %v1247_v43 }
 0x425   : > { %v770_v16 = vrot.slane %v762_v44, %v2704_v28  ;;  %v777_v15 = vrot.slane %v763_v45, %v2704_v28  ;;  %v2366_v6 = vpop.eup %2365 }
 0x426   : > { %v757_v46 = vpop.permute.xlu1 %756  ;;  %v1252_v26 = vmul.f32 %v2366_v6, %v2775_v30  ;;  %v1702_v30 = vld [vmem:[%s2985_s4] sm:$0xff] }
 0x427   : > { %v753_v47 = vpop.permute.xlu0 %752 }
 0x428   : > { %v778_v48 = vcombine.low %v753_v47, %v757_v46  ;;  %v779_v49 = vcombine.high %v753_v47, %v757_v46 }
 0x42a   : > { %v786_v50 = vrot.slane %v778_v48, %v2704_v28  ;;  %v793_v14 = vrot.slane %v779_v49, %v2704_v28  ;;  %v2368_v13 = vpop.eup %2367 }
 0x42b   : > { %v2370_v19 = vpop.eup %2369  ;;  %v1253_v27 = vmul.f32 %v2368_v13, %v2362_v32 }
 0x42c   : > { %v794_v51 = vcombine.low %v770_v16, %v786_v50  ;;  %v795_v52 = vcombine.high %v770_v16, %v786_v50  ;;  %v810_v54 = vcombine.low %v777_v15, %v793_v14  ;;  %v811_v55 = vcombine.high %v777_v15, %v793_v14 }
 0x42d   : > { %v1254_v33 = vmul.f32 %v2370_v19, %v2779_v31  ;;  %v1703_v31 = vld [vmem:[%s2985_s4 + $0x8] sm:$0xff] }
 0x42e   : > { %v802_v56 = vrot.slane %v794_v51, %v2707_v35  ;;  %v809_v57 = vrot.slane %v795_v52, %v2707_v35  ;;  %v818_v58 = vrot.slane %v810_v54, %v2707_v35  ;;  %v825_v59 = vrot.slane %v811_v55, %v2707_v35  ;;  %v2372_v25 = vpop.eup %2371  ;;  %v1704_v54 = vld [vmem:[%s2985_s4 + $0x10] sm:$0xff]  ;;  %v1705_v55 = vld [vmem:[%s2985_s4 + $0x18] sm:$0xff] }
 0x42f   : > { %v1255_v34 = vmul.f32 %v2372_v25, %v2784_v36  ;;  %v2274_v32 = vpack.c.bf16 %v1703_v31, %v1702_v30 }
 0x430   : > { %v830_v60 = vcombine.low %v802_v56, %v809_v57  ;;  %v2111_v61 = vcombine.high %v802_v56, %v809_v57  ;;  %v846_v62 = vcombine.low %v818_v58, %v825_v59  ;;  %v2112_v63 = vcombine.high %v818_v58, %v825_v59 }
 0x432   : > { %v837_v2 = vrot.slane %v830_v60, %v2704_v28  ;;  %v845_v3 = vrot.slane %v2111_v61, %v2704_v28  ;;  %v853_v4 = vrot.slane %v846_v62, %v2704_v28  ;;  %v861_v5 = vrot.slane %v2112_v63, %v2704_v28 }
 0x433   : > { %v2277_v60 = vpack.c.bf16 %v1705_v55, %v1704_v54  ;;  %v1800_v55 = vsub.s32 1, %v2701_v24 }
 0x434   : > { %v862_v7 = vcombine.low %v837_v2, %v845_v3  ;;  %v878_v9 = vcombine.low %v853_v4, %v861_v5  ;;  %v863_v10 = vcombine.high %v837_v2, %v845_v3  ;;  %v879_v12 = vcombine.high %v853_v4, %v861_v5 }
 0x436   : > { %v870_v17 = vrot.slane %v862_v7, %v2707_v35  ;;  %v886_v18 = vrot.slane %v878_v9, %v2707_v35  ;;  %v877_v20 = vrot.slane %v863_v10, %v2707_v35  ;;  %v893_v21 = vrot.slane %v879_v12, %v2707_v35 }
 0x438   : > { %v894_v22 = vcombine.low %v870_v17, %v886_v18  ;;  %v895_v23 = vcombine.high %v870_v17, %v886_v18  ;;  %v896_v29 = vcombine.low %v877_v20, %v893_v21  ;;  %v897_v11 = vcombine.high %v877_v20, %v893_v21 }
 0x43a   : > { %2207 = vmatpush3.msra.mxu0 %v894_v22  ;;  %2212 = vmatpush3.msra.mxu1 %v895_v23 }
 0x43b   : > { %2209 = vmatmul.mubr.msk.f32.vlgmr.msra.gmra.mrb[2].mxu0 %vm907_vm2, %v1252_v26  ;;  %2214 = vmatmul.mubr.msk.f32.vlgmr.msra.gmra.mrb[8].mxu1 %vm907_vm2, %v1253_v27 }
 0x43c   : > { %2216 = vmatprep.subr.mxu0 %v2478_v1  ;;  %2221 = vmatprep.subr.mxu1 %v2478_v1 }
 0x43d   : > { %2217 = vmatpush3.msra.mxu0 %v896_v29  ;;  %2222 = vmatpush3.msra.mxu1 %v897_v11 }
 0x43e   : > { %2218 = vmatprep.mubr.msk.f32.mxu0 %vm2477_vm0, %v2478_v1  ;;  %2223 = vmatprep.mubr.msk.f32.mxu1 %vm2477_vm0, %v2478_v1 }
 0x43f   : > { %2219 = vmatmul.mubr.msk.f32.vlgmr.msra.gmra.mrb[4].mxu0 %vm907_vm2, %v1254_v33  ;;  %2224 = vmatmul.mubr.msk.f32.vlgmr.msra.gmra.mrb[10].mxu1 %vm907_vm2, %v1255_v34 }
 0x440   : > { %2273 = vmatprep.subr.bf16.mxu0 %v2476_v0  ;;  %2234 = vmatprep.mubr.msk.f32.mxu0 %vm2477_vm0, %v2478_v1 }
 0x441   : > { %2279 = vmatprep.subr.bf16.mxu1 %v2476_v0  ;;  %2245 = vmatprep.mubr.msk.f32.mxu1 %vm2477_vm0, %v2478_v1 }
 0x442   : > { %2275 = vmatpush3.bf16.msra.mxu0 %v2274_v32 }
 0x443   : > { %2276 = vmatprep.subr.bf16.mxu0 %v2476_v0 }
 0x446   : > { %2278 = vmatpush3.bf16.msra.mxu0 %v2277_v60 }
 0x447   : > { %2285 = vmatprep.subr.bf16.mxu0 %v2476_v0 }
 0x50e   : > { %v1325_v36 = vpop.f32.mrb[2].mxu0  ;;  %v1398_v37 = vpop.f32.mrb[8].mxu1 }
 0x50f   : > { %v2210_v38 = vpop.f32.mrb[3].mxu0  ;;  %v2215_v39 = vpop.f32.mrb[9].mxu1 }
 0x512   : > { %v1471_v40 = vpop.f32.mrb[4].mxu0  ;;  %v1544_v41 = vpop.f32.mrb[10].mxu1 }
 0x513   : > { %v1548_v42 = vcombine.low %v1325_v36, %v1471_v40  ;;  %v1549_v43 = vcombine.high %v1325_v36, %v1471_v40  ;;  %v1564_v44 = vcombine.low %v1398_v37, %v1544_v41  ;;  %v1565_v45 = vcombine.high %v1398_v37, %v1544_v41  ;;  %v2220_v46 = vpop.f32.mrb[5].mxu0  ;;  %v2225_v47 = vpop.f32.mrb[11].mxu1  ;;  %v1808_v41 = vld [vmem:[%s2986_s5] sm:$0xff] }
 0x514   : > { %v1894_v46 = vld [vmem:[%s2988_s7 + $0x8] sm:$0xff]  ;;  %v1895_v47 = vld [vmem:[%s2988_s7 + $0x10] sm:$0xff] }
 0x515   : > { %v1556_v48 = vrot.slane %v1548_v42, %v2704_v28  ;;  %v1563_v49 = vrot.slane %v1549_v43, %v2704_v28  ;;  %v1572_v16 = vrot.slane %v1564_v44, %v2704_v28  ;;  %v1579_v15 = vrot.slane %v1565_v45, %v2704_v28  ;;  %v1811_v43 = vld [vmem:[%s2986_s5 + $0x18] sm:$0xff]  ;;  %v1893_v45 = vld [vmem:[%s2988_s7] sm:$0xff] }
 0x517   : > { %v1580_v50 = vcombine.low %v1556_v48, %v1572_v16  ;;  %v1581_v14 = vcombine.high %v1556_v48, %v1572_v16  ;;  %v1596_v51 = vcombine.low %v1563_v49, %v1579_v15  ;;  %v1597_v52 = vcombine.high %v1563_v49, %v1579_v15  ;;  %v1896_v49 = vld [vmem:[%s2988_s7 + $0x18] sm:$0xff]  ;;  %v1897_v15 = vld [vmem:[%s2988_s7 + $0x20] sm:$0xff] }
 0x518   : > { %v2286_v48 = vpack.c.bf16 %v1894_v46, %v1893_v45  ;;  %v2289_v16 = vpack.c.bf16 %v1896_v49, %v1895_v47 }
 0x519   : > { %v1588_v56 = vrot.slane %v1580_v50, %v2707_v35  ;;  %v1595_v57 = vrot.slane %v1581_v14, %v2707_v35  ;;  %v1604_v58 = vrot.slane %v1596_v51, %v2707_v35  ;;  %v1611_v59 = vrot.slane %v1597_v52, %v2707_v35  ;;  %v1898_v50 = vld [vmem:[%s2988_s7 + $0x28] sm:$0xff] }
 0x51a   : > { %v2292_v14 = vpack.c.bf16 %v1898_v50, %v1897_v15 }
 0x51b   : > { %v1616_v61 = vcombine.low %v1588_v56, %v1595_v57  ;;  %v2125_v62 = vcombine.high %v1588_v56, %v1595_v57  ;;  %v1632_v63 = vcombine.low %v1604_v58, %v1611_v59  ;;  %v2126_v2 = vcombine.high %v1604_v58, %v1611_v59 }
 0x51c   : > { %v1805_v56 = vsub.s32 2, %v2701_v24 }
 0x51d   : > { %v1623_v3 = vrot.slane %v1616_v61, %v2704_v28  ;;  %v1631_v4 = vrot.slane %v2125_v62, %v2704_v28  ;;  %v1639_v5 = vrot.slane %v1632_v63, %v2704_v28  ;;  %v1647_v6 = vrot.slane %v2126_v2, %v2704_v28  ;;  %v1900_v63 = vld [vmem:[%s2988_s7 + $0x38] sm:$0xff] }
 0x51f   : > { %v1649_v7 = vcombine.high %v1623_v3, %v1631_v4  ;;  %v1665_v9 = vcombine.high %v1639_v5, %v1647_v6  ;;  %v1648_v10 = vcombine.low %v1623_v3, %v1631_v4  ;;  %v1664_v12 = vcombine.low %v1639_v5, %v1647_v6  ;;  %v2128_v3 = vld [vmem:[%s2987_s6] ss:$0 sm:$0xff] }
 0x521   : > { %v1663_v13 = vrot.slane %v1649_v7, %v2707_v35  ;;  %v1679_v17 = vrot.slane %v1665_v9, %v2707_v35  ;;  %v1656_v18 = vrot.slane %v1648_v10, %v2707_v35  ;;  %v1672_v19 = vrot.slane %v1664_v12, %v2707_v35  ;;  %v2866_v35 = vld [vmem:[%s2989_s8] sm:$0x3f] }
 0x522   : > { %v1709_v33 = vrot.slane %v2866_v35, %v904_v53  ;;  %v1809_v53 = vld [vmem:[%s2986_s5 + $0x8] sm:$0xff]  ;;  %v1801_v57 = vrot.slane %v2866_v35, %v1800_v55  ;;  %v1806_v60 = vrot.slane %v2866_v35, %v1805_v56  ;;  %v1903_v9 = vsub.s32 3, %v2701_v24 }
 0x523   : > { %v1682_v20 = vcombine.low %v1663_v13, %v1679_v17  ;;  %v1681_v21 = vcombine.high %v1656_v18, %v1672_v19  ;;  %v1683_v22 = vcombine.high %v1663_v13, %v1679_v17  ;;  %v1680_v23 = vcombine.low %v1656_v18, %v1672_v19 }
 0x524   : > { %v2280_v42 = vpack.c.bf16 %v1809_v53, %v1808_v41  ;;  %v1904_v10 = vrot.slane %v2866_v35, %v1903_v9 }
 0x525   : > { %1689 = vrot.lane.b32.xlu1 %v1682_v20, %s2487_s27  ;;  %1685 = vrot.lane.b32.xlu0 %v1681_v21, %s2488_s29  ;;  %s2132_s29 = sshll.u32 %s2562_s13, 7  ;;  %s2490_s13 = smov [#allocation5]  }
 0x526   : > { %2281 = vmatpush3.bf16.msra.mxu1 %v2280_v42  ;;  %s2936_s20 = scalar_lea.hbm %s2990_s9, %s2132_s29 }
 0x527   : > { %2282 = vmatprep.subr.bf16.mxu1 %v2476_v0 }
 0x529   : > { %1693 = vrot.lane.b32.xlu0 %v1683_v22, %s2489_s28  ;;  %s358_s28 = scalar_lea.vmem [#allocation5], %s2103_s26  ;;  %s2411_s26 = sshll.u32 %s2490_s13, 4  ;;  %s2412_s26 = int_to_ptr.vmem [resolvable:$false] %s2411_s26 }
 0x52a   : > { %s2018_s14 = sshll.u32 %s358_s28, 4  ;;  %s2413_s25 = scalar_lea.vmem %s2412_s26, 256  ;;  %s2938_s14 = int_to_ptr.vmem [resolvable:$true] %s2018_s14 }
 0x52b   : > { %s2407_s19 = scalar_lea.vmem %s2938_s14, 128  ;;  %p2414_p10 = scmp.lt.s32.totalorder %s2938_s14, %s2412_s26 }
 0x52c   : > { %p2408_p11 = scmp.ne.s32.totalorder %s2938_s14, %s2407_s19  ;;  %p2415_p2 = scmp.lt.s32.totalorder %s2413_s25, %s2407_s19 }
 0x52e   : > { %p2409_p13 = pnand %p2408_p11, %p2999_p12  ;;  %p2416_p4 = por %p2415_p2, %p2414_p10 }
 0x530   : > { %p2410_p7 = pneg %p2409_p13 }
 0x532   : > { %p2417_p5 = pnand %p2416_p4, %p2410_p7 }
 0x597   : > { %v1686_v28 = vpop.permute.xlu0 %1685  ;;  %v1690_v25 = vpop.permute.xlu1 %1689 }
 0x598   : > { %v1696_v26 = vsel %vm907_vm2, %v1680_v23, %v1686_v28 }
 0x599   : > { %v1698_v29 = vsel %vm1697_vm4, %v1696_v26, %v1690_v25 }
 0x59b   : > { %v1694_v27 = vpop.permute.xlu0 %1693 }
 0x59c   : > { %v1700_v11 = vsel %vm1699_vm5, %v1698_v29, %v1694_v27  ;;  %v1995_v29 = vsub.s32 4, %v2701_v24 }
 0x59d   : > { %2235 = vmatmul.mubr.msk.f32.vlgmr.msra.gmra.mrb[6].mxu0 %vm374_vm1, %v1700_v11  ;;  %v2000_v11 = vsub.s32 5, %v2701_v24 }
 0x59e   : > { %2264 = vmatprep.mubr.msk.f32.mxu0 %vm2477_vm0, %v2478_v1  ;;  %2287 = vmatpush3.bf16.msra.mxu0 %v2286_v48 }
 0x59f   : > { %2288 = vmatprep.subr.bf16.mxu0 %v2476_v0 }
 0x5a2   : > { %2290 = vmatpush3.bf16.msra.mxu0 %v2289_v16 }
 0x5a3   : > { %2291 = vmatprep.subr.bf16.mxu0 %v2476_v0 }
 0x5a6   : > { %2293 = vmatpush3.bf16.msra.mxu0 %v2292_v14 }
 0x5a7   : > { %2294 = vmatprep.subr.bf16.mxu0 %v2476_v0  ;;  %v1899_v0 = vld [vmem:[%s2988_s7 + $0x30] sm:$0xff] }
 0x5a8   : > { %v2295_v2 = vpack.c.bf16 %v1900_v63, %v1899_v0 }
 0x5aa   : > { %2296 = vmatpush3.bf16.msra.mxu0 %v2295_v2 }
 0x670   : > { %v1779_v34 = vpop.f32.mrb[6].mxu0 }
 0x671   : > { %v1780_v30 = vadd.f32 %v1779_v34, %v1709_v33  ;;  %v2236_v31 = vpop.f32.mrb[7].mxu0  ;;  %v1996_v33 = vrot.slane %v2866_v35, %v1995_v29 }
 0x672   : > { %v2001_v31 = vrot.slane %v2866_v35, %v2000_v11 }
 0x673   : > { %v1783_v32 = vadd.f32 %v1780_v30, %v2675_v8  ;;  %v1810_v8 = vld [vmem:[%s2986_s5 + $0x10] sm:$0xff] }
 0x674   : > { %v2283_v44 = vpack.c.bf16 %v1811_v43, %v1810_v8 }
 0x675   : > { %v1784_v36 = vsel %vm374_vm1, %v1783_v32, 0.0 }
 0x676   : > { %1785 = vadd.xlane.f32.xlu1 %v1784_v36  ;;  %2284 = vmatpush3.bf16.msra.mxu1 %v2283_v44 }
 0x703   : > { %v1786_v37 = vpop.xlane.xlu1 %1785 }
 0x704   : > { %v1788_v38 = vmul.f32 0.03125, %v1786_v37 }
 0x706   : > { %v1789_v1 = vsub.f32 %v1783_v32, %v1788_v38 }
 0x708   : > { %v1790_v39 = vmul.f32 %v1789_v1, %v1789_v1 }
 0x70a   : > { %v1791_v40 = vsel %vm374_vm1, %v1790_v39, 0.0 }
 0x70b   : > { %1792 = vadd.xlane.f32.xlu0 %v1791_v40 }
 0x798   : > { %v1793_v51 = vpop.xlane.xlu0 %1792 }
 0x799   : > { %v1794_v52 = vmul.f32 0.03125, %v1793_v51 }
 0x79b   : > { %v1795_v54 = vadd.f32 1e-05, %v1794_v52 }
 0x79d   : > { %2373 = vrsqrt.f32 %v1795_v54 }
 0x7a7   : > { %v2374_v58 = vpop.eup %2373 }
 0x7a8   : > { %v1797_v59 = vmul.f32 %v2374_v58, %v1789_v1 }
 0x7aa   : > { %v1802_v61 = vmul.f32 %v1801_v57, %v1797_v59 }
 0x7ac   : > { %v1807_v62 = vadd.f32 %v1806_v60, %v1802_v61 }
 0x7ae   : > { %2246 = vmatmul.mubr.msk.f32.vlgmr.msra.gmra.mrb[12].mxu1 %vm374_vm1, %v1807_v62 }
 0x881   : > { %v1888_v4 = vpop.f32.mrb[12].mxu1 }
 0x882   : > { %v1889_v5 = vadd.f32 %v2128_v3, %v1888_v4  ;;  %v2247_v6 = vpop.f32.mrb[13].mxu1 }
 0x884   : > { %v1892_v7 = vmax.f32 %v1889_v5, 0.0 }
 0x886   : > { %2265 = vmatmul.mubr.msk.f32.vlgmr.msra.gmra.mrb[8].mxu0 %vm1905_vm6, %v1892_v7 }
 0x959   : > { %v1975_v12 = vpop.f32.mrb[8].mxu0 }
 0x95a   : > { %v1976_v13 = vadd.f32 %v1975_v12, %v1904_v10  ;;  %v2266_v17 = vpop.f32.mrb[9].mxu0 }
 0x95c   : > { %v1979_v18 = vadd.f32 %v1976_v13, %v1807_v62 }
 0x95e   : > { %v1980_v19 = vsel %vm374_vm1, %v1979_v18, 0.0 }
 0x95f   : > { %1981 = vadd.xlane.f32.xlu0 %v1980_v19 }
 0x9ec   : > { %v1982_v20 = vpop.xlane.xlu0 %1981 }
 0x9ed   : > { %v1983_v21 = vmul.f32 0.03125, %v1982_v20 }
 0x9ef   : > { %v1984_v22 = vsub.f32 %v1979_v18, %v1983_v21 }
 0x9f1   : > { %v1985_v23 = vmul.f32 %v1984_v22, %v1984_v22 }
 0x9f3   : > { %v1986_v28 = vsel %vm374_vm1, %v1985_v23, 0.0 }
 0x9f4   : > { %1987 = vadd.xlane.f32.xlu1 %v1986_v28 }
 0xa81   : > { %v1988_v25 = vpop.xlane.xlu1 %1987 }
 0xa82   : > { %v1989_v26 = vmul.f32 0.03125, %v1988_v25 }
 0xa84   : > { %v1990_v27 = vadd.f32 1e-05, %v1989_v26 }
 0xa86   : > { %2375 = vrsqrt.f32 %v1990_v27 }
 0xa90   : > { %v2376_v34 = vpop.eup %2375 }
 0xa91   : > { %v1992_v30 = vmul.f32 %v2376_v34, %v1984_v22 }
 0xa93   : > { %v1997_v32 = vmul.f32 %v1996_v33, %v1992_v30 }
 0xa95   : > { %v2002_v36 = vadd.f32 %v2001_v31, %v1997_v32 }
 0xa97   : > { %2003 = vst.msk [vmem:[%s358_s28] sm:$0xff] %vm374_vm1, %v2002_v36 }
 0xa98   : > { %2420 = shalt.err (!%p2417_p5)
}
 0xa99   : > { %s2421_s24 = scalar_lea.hbm %s2936_s20, 128  ;;  %s2425_s28 = scalar_lea.hbm %s2990_s9, 256 }
 0xa9a   : > { %p2422_p8 = scmp.ne.s32.totalorder %s2936_s20, %s2421_s24  ;;  %p2426_p1 = scmp.lt.u32.totalorder %s2936_s20, %s2990_s9 }
 0xa9b   : > { %p2427_p3 = scmp.lt.u32.totalorder %s2425_s28, %s2421_s24  ;;  %p2429_p11 = scmp.lt.u32.totalorder %s2421_s24, %s2936_s20 }
 0xa9c   : > { %p2423_p9 = pnand %p2422_p8, %p2999_p12 }
 0xa9d   : > { %p2428_p6 = por %p2427_p3, %p2426_p1 }
 0xa9e   : > { %p2424_p0 = pneg %p2423_p9 }
 0xa9f   : > { %p2430_p13 = por %p2429_p11, %p2428_p6 }
 0xaa1   : > { %p2431_p7 = pnand %p2430_p13, %p2424_p0 }
 0xaa3   : > { %2434 = shalt.err (!%p2431_p7)
}
 0xaa4   : > { %2299 = dma.vmem_to_hbm [thread:$0]  (%p2999_p12), %s2938_s14, 128, %s2936_s20, %s2005_s23  }
 0xaa5 PF: > { %s2030_s19 = sand.u32 1, %s2461_s30   ;;  %p3000_p10 = scmp.ne.s32.totalorder %s2995_s22, 0 }
 0xaa6   : > { %p3001_p2 = scmp.ge.s32.totalorder %s2473_s12, 2  ;;  %s2031_s13 = scalar_lea.sflag [#allocation4], %s2030_s19 }
 0xaa8   : > { %p2306_p4 = pnand %p3001_p2, %p3000_p10 }
 0xaaa   : > { %2456 = dma.done.wait (!%p2306_p4), %s2031_s13, 128  }
 0xaab   : > { %2458 = vsyncadd (!%p2306_p4), %s2031_s13, 4294967168  ;;  %p22_p5 = scmp.ge.s32.totalorder %s2566_s15, 4   ;;  %s3002_s30 = smov %s2465_s10 }
 0xaac   : > { %s3003_s10 = smov %s2469_s11  ;;  %s3004_s11 = smov %s2578_s18 }
 0xaad   : > { %s3005_s12 = smov %s2566_s15  ;;  %24 = sbr.rel (!%p22_p5) target bundleno = 5 (0x5), region = 104 }
 0xab4   :  { %2036 = vsyncpa [#allocation3], 1 }
 0xab5   :  { %2038 = vsyncpa [#allocation3 + $0x1], 1 }
 0xab6   :  { %2039 = vsyncpa [#allocation4], 1 }
 0xab7   :  { %2041 = vsyncpa [#allocation4 + $0x1], 1 }

</bundles_post_ra>
